<compile_context>
chip_gen: v7x
topology: tpu7x:2x2x1
jax: 0.10.0
libtpu: 0.0.40
codegen_flags: <defaults>
</compile_context>

<pallas_src>
import functools

import jax
import jax.numpy as jnp
from jax.experimental import pallas as pl
from jax.experimental.pallas import tpu as pltpu


def _round_up(x: int, m: int) -> int:
    return (x + m - 1) // m * m


def _cdiv(a: int, b: int) -> int:
    return (a + b - 1) // b


def _choose_tile_n(n: int) -> int:
    # Large tiles amortize the ~0.35 us per-grid-step overhead (tile 128 hits
    # ~29% of HBM roofline vs ~86% at 1024+), but:
    #   * keep >= 2 grid steps when N allows it so both v7x TensorCores get
    #     work under dimension_semantics=("parallel",),
    #   * cap at 4096 so the lane-padded bf16 feature tiles + f32 output tile
    #     stay comfortably inside v5e's 16 MiB default scoped-VMEM limit.
    tile = 2048
    if n > 128:
        tile = min(tile, _round_up(_cdiv(n, 2), 128))
    tile = min(tile, _round_up(n, 128), 4096)
    return max(128, tile)


def prepare_encoder1_weights(weight, weight1, feat_dim,
                             compute_dtype=jnp.bfloat16):
    """Build the stacked weight [W ; W1 ; (0 | I)] of shape (2E + D, 2D).

    Hoisted out of the forward path: call once per weight update and reuse.
    The (0 | I) block makes the single MXU contraction also emit
    neigh_feats.T, so the kernel needs no transpose of the neighbor features.
    """
    E = weight.shape[0]
    D = feat_dim
    assert weight.shape == (E, 2 * D) and weight1.shape == (E, 2 * D)
    passthrough = jnp.concatenate(
        [jnp.zeros((D, D), jnp.float32), jnp.eye(D, dtype=jnp.float32)], axis=1)
    w_stacked = jnp.concatenate(
        [weight.astype(jnp.float32), weight1.astype(jnp.float32), passthrough],
        axis=0)
    return w_stacked.astype(compute_dtype)          # (2E + D, 2D)


def encoder1_kernel(comb_ref, w_ref, out_ref, *, embed_dim):
    comb = comb_ref[...].astype(w_ref.dtype)        # (tile_n, 2D)
    w = w_ref[...]                                  # (2E + D, 2D)

    # Single MXU contraction over the shared 2D feature axis.  Output comes
    # out in (row, node) orientation -> already lane-dense along the node tile.
    dn = (((1,), (1,)), ((), ()))
    logits = jax.lax.dot_general(w, comb, dn,
                                 preferred_element_type=jnp.float32)
    # logits: (2E + D, tile_n) f32
    e = embed_dim
    combine_t = jnp.tanh(logits[:e, :])                # tanh(W  @ combined.T)
    attention_t = jax.nn.sigmoid(logits[e:2 * e, :])   # sigmoid(W1 @ combined.T)
    tanh_neigh_t = jnp.tanh(logits[2 * e:, :])         # tanh(neigh_feats).T

    # attention.T*combine.T + attention.T*tanh(neigh) == att * (comb + tanh(neigh))
    out_ref[...] = (attention_t * (combine_t + tanh_neigh_t)).astype(out_ref.dtype)


def encoder1_forward(combined, w_stacked, *, embed_dim, feat_dim,
                     tile_n=None, out_dtype=jnp.float32):
    """Pallas port of Encoder1.forward hot path.

    combined:  (N, 2D)  -- cat([self_feats, neigh_feats], axis=1) (any float dtype;
               it is cast in-kernel to the stacked-weight dtype for the MXU).
    w_stacked: (2E + D, 2D) from prepare_encoder1_weights (E must equal D).
    Returns (E, N) in out_dtype, matching the PyTorch module's `combine.t()`.
    """
    N, two_d = combined.shape
    D, E = feat_dim, embed_dim
    assert two_d == 2 * D
    assert w_stacked.shape == (2 * E + D, 2 * D)
    assert E == D, "elementwise add with tanh(neigh_feats) requires embed_dim == feat_dim"

    if tile_n is None:
        tile_n = _choose_tile_n(N)
    tile_n = max(128, _round_up(tile_n, 128))
    grid = _cdiv(N, tile_n)     # ragged last block handled by Pallas masking

    kernel = functools.partial(encoder1_kernel, embed_dim=E)

    return pl.pallas_call(
        kernel,
        out_shape=jax.ShapeDtypeStruct((E, N), out_dtype),
        grid=(grid,),
        in_specs=[
            pl.BlockSpec((tile_n, 2 * D), lambda i: (i, 0)),
            pl.BlockSpec((2 * E + D, 2 * D), lambda i: (0, 0)),
        ],
        out_specs=pl.BlockSpec((E, tile_n), lambda i: (0, i)),
        compiler_params=pltpu.CompilerParams(
            dimension_semantics=("parallel",)),
    )(combined, w_stacked)


def _reference(self_feats, neigh_feats, weight, weight1):
    combined = jnp.concatenate([self_feats, neigh_feats], axis=1)   # (N, 2D)
    combine = jnp.tanh(weight @ combined.T)                         # (E, N)
    attention = jax.nn.sigmoid(weight1 @ combined.T)                # (E, N)
    out = attention.T * combine.T + attention.T * jnp.tanh(neigh_feats)
    return out.T                                                    # (E, N)


if __name__ == "__main__":
    key = jax.random.PRNGKey(0)
    k_sf, k_nf, k_w, k_w1 = jax.random.split(key, 4)

    N = 600          # exercises the ragged last block (no pad/slice path)
    feat_dim = 32
    embed_dim = 32   # must equal feat_dim (module's elementwise add implies this)

    # Synthetic stand-ins for features(nodes) and aggregator.forward(...)
    self_feats = jax.random.normal(k_sf, (N, feat_dim), dtype=jnp.float32)
    neigh_feats = jax.random.normal(k_nf, (N, feat_dim), dtype=jnp.float32)

    # Deterministic xavier_uniform init for weight / weight1, shape (E, 2D)
    fan_in, fan_out = 2 * feat_dim, embed_dim
    bound = jnp.sqrt(6.0 / (fan_in + fan_out))
    weight = jax.random.uniform(k_w, (embed_dim, 2 * feat_dim),
                                minval=-bound, maxval=bound, dtype=jnp.float32)
    weight1 = jax.random.uniform(k_w1, (embed_dim, 2 * feat_dim),
                                 minval=-bound, maxval=bound, dtype=jnp.float32)

    # The module's torch.cat([self_feats, neigh_feats], dim=1): the kernel
    # ingests this single combined tensor (one DMA stream, 64/128 lane fill).
    combined_f32 = jnp.concatenate([self_feats, neigh_feats], axis=1)

    ref = _reference(self_feats, neigh_feats, weight, weight1)

    # --- fast path: bf16 operand I/O, f32 MXU accumulation, f32 output -------
    w_bf16 = prepare_encoder1_weights(weight, weight1, feat_dim,
                                      compute_dtype=jnp.bfloat16)   # once per weight update
    combined_bf16 = combined_f32.astype(jnp.bfloat16)
    out_bf16 = encoder1_forward(combined_bf16, w_bf16,
                                embed_dim=embed_dim, feat_dim=feat_dim)
    out_bf16 = jax.block_until_ready(out_bf16)
    assert out_bf16.shape == (embed_dim, N)
    assert jnp.allclose(out_bf16, ref, atol=2e-2, rtol=2e-2)

    # bf16-output variant (halves output HBM bytes if the consumer tolerates it)
    out_bf16_out = encoder1_forward(combined_bf16, w_bf16,
                                    embed_dim=embed_dim, feat_dim=feat_dim,
                                    out_dtype=jnp.bfloat16)
    out_bf16_out = jax.block_until_ready(out_bf16_out)
    assert out_bf16_out.dtype == jnp.bfloat16
    assert jnp.allclose(out_bf16_out.astype(jnp.float32), ref,
                        atol=4e-2, rtol=4e-2)

    # --- full-precision path for tight numerical validation ------------------
    w_f32 = prepare_encoder1_weights(weight, weight1, feat_dim,
                                     compute_dtype=jnp.float32)
    out_f32 = encoder1_forward(combined_f32, w_f32,
                               embed_dim=embed_dim, feat_dim=feat_dim)
    out_f32 = jax.block_until_ready(out_f32)
    assert out_f32.shape == (embed_dim, N)
    assert jnp.allclose(out_f32, ref, atol=1e-4, rtol=1e-4)

    print("KERNEL_OK")
</pallas_src>

<mosaic_0001>
module attributes {stable_mosaic.version = 11 : i64} {
  func.func @encoder1_kernel(%arg0: i32, %arg1: memref<384x64xbf16, #tpu.memory_space<vmem>>, %arg2: memref<96x64xbf16, #tpu.memory_space<vmem>>, %arg3: memref<32x384xf32, #tpu.memory_space<vmem>>) attributes {dimension_semantics = [#tpu.dimension_semantics<parallel>], iteration_bounds = array<i64: 2>, scalar_prefetch = 0 : i64, scratch_operands = 0 : i64, tpu.core_type = #tpu.core_type<tc>, window_params = [{transform_indices = @transform_0, window_bounds = array<i64: 384, 64>}, {pipeline_mode = #tpu.pipeline_mode<synchronous>, transform_indices = @transform_1, window_bounds = array<i64: 96, 64>}, {transform_indices = @transform_2, window_bounds = array<i64: 32, 384>}]} {
    %c0 = arith.constant 0 : index
    %c0_0 = arith.constant 0 : index
    %0 = vector.load %arg1[%c0, %c0_0] : memref<384x64xbf16, #tpu.memory_space<vmem>>, vector<384x64xbf16>
    %c0_1 = arith.constant 0 : index
    %c0_2 = arith.constant 0 : index
    %1 = vector.load %arg2[%c0_1, %c0_2] : memref<96x64xbf16, #tpu.memory_space<vmem>>, vector<96x64xbf16>
    %cst = arith.constant dense<0.000000e+00> : vector<96x384xf32>
    %2 = tpu.matmul %1, %0, %cst {dimension_numbers = #tpu.dot_dimension_numbers<[1], [1], [0], [0], [0, 0, 1, 0], [], []>} : vector<96x64xbf16>, vector<384x64xbf16>, vector<96x384xf32> -> vector<96x384xf32>
    %3 = vector.extract_strided_slice %2 {offsets = [0, 0], sizes = [32, 384], strides = [1, 1]} : vector<96x384xf32> to vector<32x384xf32>
    %4 = math.tanh %3 : vector<32x384xf32>
    %5 = vector.extract_strided_slice %2 {offsets = [32, 0], sizes = [32, 384], strides = [1, 1]} : vector<96x384xf32> to vector<32x384xf32>
    %6 = arith.negf %5 : vector<32x384xf32>
    %7 = math.exp %6 : vector<32x384xf32>
    %cst_3 = arith.constant 1.000000e+00 : f32
    %8 = vector.broadcast %cst_3 : f32 to vector<32x384xf32>
    %9 = arith.addf %8, %7 : vector<32x384xf32>
    %10 = arith.divf %8, %9 : vector<32x384xf32>
    %11 = vector.extract_strided_slice %2 {offsets = [64, 0], sizes = [32, 384], strides = [1, 1]} : vector<96x384xf32> to vector<32x384xf32>
    %12 = math.tanh %11 : vector<32x384xf32>
    %13 = arith.addf %4, %12 : vector<32x384xf32>
    %14 = arith.mulf %10, %13 : vector<32x384xf32>
    %c0_4 = arith.constant 0 : index
    %c0_5 = arith.constant 0 : index
    %15 = vector.load %arg3[%c0_4, %c0_5] : memref<32x384xf32, #tpu.memory_space<vmem>>, vector<32x384xf32>
    tpu.vector_store %arg3[%c0_4, %c0_5], %14 {strides = array<i32>} : memref<32x384xf32, #tpu.memory_space<vmem>>, vector<32x384xf32>,
    return
  }
  func.func @transform_0(%arg0: i32) -> (i32, i32) {
    %c0_i32 = arith.constant 0 : i32
    %c0_i32_0 = arith.constant 0 : i32
    return %arg0, %c0_i32 : i32, i32
  }
  func.func @transform_1(%arg0: i32) -> (i32, i32) {
    %c0_i32 = arith.constant 0 : i32
    %c0_i32_0 = arith.constant 0 : i32
    %c0_i32_1 = arith.constant 0 : i32
    return %c0_i32, %c0_i32_0 : i32, i32
  }
  func.func @transform_2(%arg0: i32) -> (i32, i32) {
    %c0_i32 = arith.constant 0 : i32
    %c0_i32_0 = arith.constant 0 : i32
    return %c0_i32, %arg0 : i32, i32
  }
}

</mosaic_0001>

<bundles_post_ra>
// kernel: tpu_custom_call.1
= control target key start
LH: loop header
LB: loop body
LE: loop exit
PB: predicated region body
PF: predicated region fallthrough
CT: control target
= control target key end

     0   :  { %7 = vsyncpa [#allocation3], 0  ;;  %s1529_s0 = inlined_call_operand.vmem [shape: bf16[600,64], index: 0, kind: input, shape index: {}]   ;;  %s1530_s1 = inlined_call_operand.vmem [shape: bf16[96,64], index: 1, kind: input, shape index: {}]   ;;  %s1531_s2 = inlined_call_operand.hbm [shape: f32[32,600], index: 2, kind: output, shape index: {}]  }
   0x1   :  { %9 = vsyncpa [#allocation3 + $0x1], 0  ;;  %s1265_s9 = smov 0   ;;  %s1267_s10 = smov 0  }
   0x2   :  { %s1269_s11 = smov 0   ;;  %s1271_s12 = smov 0  }
   0x3 LB: > { %s1286_s13 = sadd.s32 4294967295, %s1245_s12   ;;  %s860_s14 = sadd.s32 4294967294, %s1245_s12   ;;  %s1245_s12 = sphi %s1271_s12, %s1537_s12   ;;  %s1241_s11 = sphi %s1269_s11, %s1536_s11   ;;  %s1237_s10 = sphi %s1267_s10, %s1535_s10   ;;  %s1233_s9 = sphi %s1265_s9, %s1534_s9  }
   0x4   : > { %s1290_s15 = sadd.s32 1, %s1245_s12   ;;  %s69_s16 = sadd.s32 1, %s1241_s11 }
   0x5   : > { %s66_s17 = ssub.s32 %s1245_s12, %s1290_s15  ;;  %p79_p0 = scmp.ne.s32.totalorder %s1241_s11, %s1237_s10 }
   0x6   : > { %p67_p1 = scmp.eq.s32.totalorder %s66_s17, 0  ;;  %p80_p2 = scmp.eq.s32.totalorder %s1286_s13, 1 }
   0x7   : > { %p85_p3 = scmp.ne.s32.totalorder %s1237_s10, %s1233_s9  ;;  %p86_p4 = scmp.eq.s32.totalorder %s860_s14, 1 }
   0x8   : > { %s1301_s18 = scalar_select %p67_p1, %s1241_s11, %s69_s16  }
   0x9   : > { %p1303_p5 = por %p80_p2, %p79_p0  ;;  %p1307_p6 = por %p86_p4, %p85_p3 }
   0xa   : > { %p863_p7 = scmp.ge.s32.totalorder %s1245_s12, 1  ;;  %p124_p8 = scmp.lt.s32.totalorder %s1245_s12, 3 }
   0xc   : > { %p125_p9 = pnand %p863_p7, %p124_p8 }
   0xd   : > { %s150_s21 = smul.u32 (!%p125_p9), 48, %s1286_s13  ;;  %v1317_v0 = vld [vmem:[%s1530_s1] sm:$0xff] (!%p125_p9)   ;;  %vm380_vm0 = vcmask (!%p125_p9), 523264   ;;  %v1082_v41 = vld [vmem:[%s1530_s1 + $0x8] sm:$0xff] (!%p125_p9)   ;;  %v1083_v42 = vld [vmem:[%s1530_s1 + $0x10] sm:$0xff] (!%p125_p9)   ;;  %s147_s16 = sand.u32 (!%p125_p9), 1, %s1237_s10  }
   0xe   : > { %128 = sbr.rel (%p125_p9) target bundleno = 395 (0x18b), region = 28  ;;  %946 = vmatprep.mubr.msk.bf16.mxu0 (!%p125_p9), %vm380_vm0, %v1317_v0  ;;  %988 = vmatprep.mubr.msk.bf16.mxu1 (!%p125_p9), %vm380_vm0, %v1317_v0  ;;  %v1084_v43 = vld [vmem:[%s1530_s1 + $0x18] sm:$0xff] (!%p125_p9)   ;;  %v1085_v44 = vld [vmem:[%s1530_s1 + $0x20] sm:$0xff] (!%p125_p9)   ;;  %v1086_v45 = vld [vmem:[%s1530_s1 + $0x28] sm:$0xff] (!%p125_p9)   ;;  %s1462_s22 = scalar_lea.sflag (!%p125_p9), [#allocation3], %s147_s16 }
   0xf   : > { %p155_p10 = scmp.lt.s32.totalorder (!%p125_p9), %s150_s21, 74  ;;  %s1016_s17 = smul.u32 (!%p125_p9), 96, %s147_s16 }
  0x15   : > { %s1539_s21 = smov (!%p155_p10, %s150_s21), 74  ;;  %s785_s23 = smul.u32 (%p1303_p5), 3, %s1286_s13 }
  0x16   : > { %s864_s24 = sshll.u32 %s1539_s21, 2  ;;  %s1438_s21 = scalar_lea.vmem [#allocation2], %s1016_s17 }
  0x17   : > { %s1326_s27 = scalar_lea.vmem %s1529_s0, %s864_s24  ;;  %s786_s24 = ssub.s32 (%p1303_p5), 5, %s785_s23 }
  0x18   : > { %v1057_v1 = vld [vmem:[%s1326_s27 + $0x40] sm:$0xff]   ;;  %v1060_v5 = vld [vmem:[%s1326_s27 + $0x48] sm:$0xff]   ;;  %v1064_v10 = vld [vmem:[%s1326_s27 + $0x90] sm:$0xff]   ;;  %p787_p11 = scmp.lt.s32.totalorder (%p1303_p5), %s786_s24, 3 }
  0x19   : > { %v1058_v2 = vld [vmem:[%s1326_s27 + $0x80] sm:$0xff]   ;;  %1000 = vmatprep.subr.msk.bf16.mxu0 %vm380_vm0, %v1057_v1  ;;  %v1061_v7 = vld [vmem:[%s1326_s27 + $0x88] sm:$0xff]   ;;  %v1063_v12 = vld [vmem:[%s1326_s27 + $0x50] sm:$0xff]   ;;  %v454_v14 = vsel %vm380_vm0, %v1064_v10, 0 }
  0x1a   : > { %v1059_v3 = vld [vmem:[%s1326_s27] sm:$0xff]   ;;  %1008 = vmatprep.subr.msk.bf16.mxu1 %vm380_vm0, %v1058_v2  ;;  %v448_v4 = vsel %vm380_vm0, %v1058_v2, 0  ;;  %v1062_v8 = vld [vmem:[%s1326_s27 + $0x8] sm:$0xff]   ;;  %v451_v9 = vsel %vm380_vm0, %v1061_v7, 0  ;;  %v1065_v13 = vld [vmem:[%s1326_s27 + $0x10] sm:$0xff]  }
  0x1b   : > { %v400_v6 = vsel %vm380_vm0, %v1059_v3, 0  ;;  %973 = vmatpush3.bf16.xpose.msra.mxu1 %v448_v4  ;;  %v403_v11 = vsel %vm380_vm0, %v1062_v8, 0  ;;  %v1067_v15 = vld [vmem:[%s1326_s27 + $0x98] sm:$0xff]   ;;  %v406_v16 = vsel %vm380_vm0, %v1065_v13, 0  ;;  %v1070_v20 = vld [vmem:[%s1326_s27 + $0xa0] sm:$0xff]   ;;  %v1073_v25 = vld [vmem:[%s1326_s27 + $0xa8] sm:$0xff]  }
  0x1c   : > { %931 = vmatpush3.bf16.xpose.msra.mxu0 %v400_v6  ;;  %1009 = vmatprep.subr.msk.bf16.mxu1 %vm380_vm0, %v1061_v7  ;;  %v1066_v17 = vld [vmem:[%s1326_s27 + $0x58] sm:$0xff]   ;;  %v457_v19 = vsel %vm380_vm0, %v1067_v15, 0  ;;  %v1069_v22 = vld [vmem:[%s1326_s27 + $0x60] sm:$0xff]   ;;  %v460_v24 = vsel %vm380_vm0, %v1070_v20, 0  ;;  %v1072_v27 = vld [vmem:[%s1326_s27 + $0x68] sm:$0xff]   ;;  %v463_v29 = vsel %vm380_vm0, %v1073_v25, 0 }
  0x1d   : > { %1001 = vmatprep.subr.msk.bf16.mxu0 %vm380_vm0, %v1060_v5  ;;  %v1068_v18 = vld [vmem:[%s1326_s27 + $0x18] sm:$0xff]   ;;  %v1071_v23 = vld [vmem:[%s1326_s27 + $0x20] sm:$0xff]   ;;  %v1074_v28 = vld [vmem:[%s1326_s27 + $0x28] sm:$0xff]  }
  0x1e   : > { %v409_v21 = vsel %vm380_vm0, %v1068_v18, 0  ;;  %v412_v26 = vsel %vm380_vm0, %v1071_v23, 0  ;;  %v1076_v30 = vld [vmem:[%s1326_s27 + $0xb0] sm:$0xff]   ;;  %v415_v31 = vsel %vm380_vm0, %v1074_v28, 0  ;;  %v1079_v35 = vld [vmem:[%s1326_s27 + $0xb8] sm:$0xff]  }
  0x1f   : > { %v1075_v32 = vld [vmem:[%s1326_s27 + $0x70] sm:$0xff]   ;;  %v466_v34 = vsel %vm380_vm0, %v1076_v30, 0  ;;  %v1078_v37 = vld [vmem:[%s1326_s27 + $0x78] sm:$0xff]   ;;  %v469_v39 = vsel %vm380_vm0, %v1079_v35, 0 }
  0x20   : > { %v1077_v33 = vld [vmem:[%s1326_s27 + $0x30] sm:$0xff]   ;;  %v1080_v38 = vld [vmem:[%s1326_s27 + $0x38] sm:$0xff]  }
  0x21   : > { %v418_v36 = vsel %vm380_vm0, %v1077_v33, 0  ;;  %v421_v40 = vsel %vm380_vm0, %v1080_v38, 0 }
  0x23   : > { %975 = vmatpush3.bf16.xpose.msra.mxu1 %v451_v9 }
  0x24   : > { %933 = vmatpush3.bf16.xpose.msra.mxu0 %v403_v11  ;;  %1010 = vmatprep.subr.msk.bf16.mxu1 %vm380_vm0, %v1064_v10 }
  0x25   : > { %1002 = vmatprep.subr.msk.bf16.mxu0 %vm380_vm0, %v1063_v12 }
  0x2b   : > { %977 = vmatpush3.bf16.xpose.msra.mxu1 %v454_v14 }
  0x2c   : > { %935 = vmatpush3.bf16.xpose.msra.mxu0 %v406_v16  ;;  %1011 = vmatprep.subr.msk.bf16.mxu1 %vm380_vm0, %v1067_v15 }
  0x2d   : > { %1003 = vmatprep.subr.msk.bf16.mxu0 %vm380_vm0, %v1066_v17 }
  0x33   : > { %979 = vmatpush3.bf16.xpose.msra.mxu1 %v457_v19 }
  0x34   : > { %937 = vmatpush3.bf16.xpose.msra.mxu0 %v409_v21  ;;  %1012 = vmatprep.subr.msk.bf16.mxu1 %vm380_vm0, %v1070_v20 }
  0x35   : > { %1004 = vmatprep.subr.msk.bf16.mxu0 %vm380_vm0, %v1069_v22 }
  0x3b   : > { %981 = vmatpush3.bf16.xpose.msra.mxu1 %v460_v24 }
  0x3c   : > { %939 = vmatpush3.bf16.xpose.msra.mxu0 %v412_v26  ;;  %1013 = vmatprep.subr.msk.bf16.mxu1 %vm380_vm0, %v1073_v25 }
  0x3d   : > { %1005 = vmatprep.subr.msk.bf16.mxu0 %vm380_vm0, %v1072_v27 }
  0x43   : > { %983 = vmatpush3.bf16.xpose.msra.mxu1 %v463_v29 }
  0x44   : > { %941 = vmatpush3.bf16.xpose.msra.mxu0 %v415_v31  ;;  %1014 = vmatprep.subr.msk.bf16.mxu1 %vm380_vm0, %v1076_v30 }
  0x45   : > { %1006 = vmatprep.subr.msk.bf16.mxu0 %vm380_vm0, %v1075_v32 }
  0x4b   : > { %985 = vmatpush3.bf16.xpose.msra.mxu1 %v466_v34 }
  0x4c   : > { %943 = vmatpush3.bf16.xpose.msra.mxu0 %v418_v36  ;;  %1015 = vmatprep.subr.msk.bf16.mxu1 %vm380_vm0, %v1079_v35 }
  0x4d   : > { %1007 = vmatprep.subr.msk.bf16.mxu0 %vm380_vm0, %v1078_v37 }
  0x53   : > { %987 = vmatpush3.bf16.xpose.msra.mxu1 %v469_v39 }
  0x54   : > { %945 = vmatpush3.bf16.xpose.msra.mxu0 %v421_v40 }
  0x5a   : > { %989 = vmatmul.mubr.msk.bf16.vlgmr.msra.gmra.mrb[0].mxu1 %vm380_vm0, %v1082_v41 }
  0x5b   : > { %947 = vmatmul.mubr.msk.bf16.vlgmr.msra.gmra.mrb[0].mxu0 %vm380_vm0, %v1317_v0  ;;  %992 = vmatprep.mubr.msk.bf16.mxu1 %vm380_vm0, %v1083_v42 }
  0x5c   : > { %948 = vmatprep.mubr.msk.bf16.mxu0 %vm380_vm0, %v1082_v41 }
  0x62   : > { %993 = vmatmul.mubr.msk.bf16.gmra.mrb[4].mxu1 %vm380_vm0, %v1084_v43 }
  0x63   : > { %949 = vmatmul.mubr.msk.bf16.gmra.mrb[4].mxu0 %vm380_vm0, %v1082_v41  ;;  %996 = vmatprep.mubr.msk.bf16.mxu1 %vm380_vm0, %v1085_v44 }
  0x64   : > { %950 = vmatprep.mubr.msk.bf16.mxu0 %vm380_vm0, %v1083_v42 }
  0x6a   : > { %997 = vmatmul.mubr.msk.bf16.gmra.mrb[8].mxu1 %vm380_vm0, %v1086_v45 }
  0x6b   : > { %951 = vmatmul.mubr.msk.bf16.gmra.mrb[8].mxu0 %vm380_vm0, %v1083_v42 }
  0x6c   : > { %952 = vmatprep.mubr.msk.bf16.mxu0 %vm380_vm0, %v1084_v43 }
  0x73   : > { %953 = vmatmul.mubr.msk.bf16.gmra.mrb[12].mxu0 %vm380_vm0, %v1084_v43 }
  0x74   : > { %954 = vmatprep.mubr.msk.bf16.mxu0 %vm380_vm0, %v1085_v44 }
  0x7b   : > { %955 = vmatmul.mubr.msk.bf16.gmra.mrb[16].mxu0 %vm380_vm0, %v1085_v44 }
  0x7c   : > { %956 = vmatprep.mubr.msk.bf16.mxu0 %vm380_vm0, %v1086_v45 }
  0x83   : > { %957 = vmatmul.mubr.msk.bf16.gmra.mrb[20].mxu0 %vm380_vm0, %v1086_v45 }
 0x12d   : > { %v990_v46 = vpop.f32.mrb[0].mxu1 }
 0x12e   : > { %v505_v47 = vpop.f32.mrb[0].mxu0  ;;  %v598_v48 = vpop.f32.mrb[1].mxu1  ;;  %1087 = vtanh.f32 %v990_v46 }
 0x12f   : > { %v507_v49 = vpop.f32.mrb[1].mxu0  ;;  %v991_v50 = vpop.f32.mrb[2].mxu1  ;;  %1089 = vtanh.f32 %v505_v47 }
 0x130   : > { %v509_v51 = vpop.f32.mrb[2].mxu0  ;;  %v601_v52 = vpop.f32.mrb[3].mxu1  ;;  %1091 = vtanh.f32 %v507_v49 }
 0x131   : > { %v511_v53 = vpop.f32.mrb[3].mxu0  ;;  %1093 = vtanh.f32 %v509_v51 }
 0x132   : > { %1095 = vtanh.f32 %v511_v53 }
 0x133   : > { %1097 = vtanh.f32 %v598_v48 }
 0x134   : > { %1099 = vtanh.f32 %v991_v50 }
 0x135   : > { %v994_v54 = vpop.f32.mrb[4].mxu1  ;;  %1101 = vtanh.f32 %v601_v52 }
 0x136   : > { %v515_v55 = vpop.f32.mrb[4].mxu0  ;;  %v915_v56 = vmul.f32 -1.442695, %v994_v54  ;;  %v614_v57 = vpop.f32.mrb[5].mxu1 }
 0x137   : > { %v517_v58 = vpop.f32.mrb[5].mxu0  ;;  %v909_v59 = vmul.f32 -1.442695, %v614_v57  ;;  %v995_v60 = vpop.f32.mrb[6].mxu1 }
 0x138   : > { %1103 = vpow2.f32 %v915_v56  ;;  %v519_v61 = vpop.f32.mrb[6].mxu0  ;;  %v918_v62 = vmul.f32 -1.442695, %v995_v60  ;;  %v617_v63 = vpop.f32.mrb[7].mxu1 }
 0x139   : > { %1105 = vtanh.f32 %v515_v55  ;;  %v1417_v0 = vpop.f32.mrb[7].mxu0  ;;  %v1088_v1 = vpop.eup %1087  ;;  %v912_v2 = vmul.f32 -1.442695, %v617_v63 }
 0x13a   : > { %1107 = vpow2.f32 %v909_v59  ;;  %v1419_v3 = vpop.eup %1089 }
 0x13b   : > { %1109 = vtanh.f32 %v517_v58  ;;  %v1421_v4 = vpop.eup %1091 }
 0x13c   : > { %1111 = vpow2.f32 %v918_v62  ;;  %v1423_v5 = vpop.eup %1093 }
 0x13d   : > { %1113 = vtanh.f32 %v519_v61  ;;  %v998_v6 = vpop.f32.mrb[8].mxu1  ;;  %v1425_v7 = vpop.eup %1095 }
 0x13e   : > { %1115 = vpow2.f32 %v912_v2  ;;  %v525_v8 = vpop.f32.mrb[8].mxu0  ;;  %v630_v9 = vpop.f32.mrb[9].mxu1 }
 0x13f   : > { %v1098_v10 = vpop.eup %1097  ;;  %v907_v11 = vmul.f32 -1.442695, %v525_v8  ;;  %1117 = vtanh.f32 %v998_v6  ;;  %v527_v12 = vpop.f32.mrb[9].mxu0 }
 0x140   : > { %v999_v13 = vpop.f32.mrb[10].mxu1  ;;  %v1100_v14 = vpop.eup %1099  ;;  %v908_v15 = vmul.f32 -1.442695, %v527_v12  ;;  %1119 = vtanh.f32 %v630_v9 }
 0x141   : > { %v529_v16 = vpop.f32.mrb[10].mxu0  ;;  %v633_v17 = vpop.f32.mrb[11].mxu1  ;;  %1121 = vpow2.f32 %v907_v11 }
 0x142   : > { %v1427_v18 = vpop.eup %1101  ;;  %v910_v19 = vmul.f32 -1.442695, %v529_v16  ;;  %v531_v20 = vpop.f32.mrb[11].mxu0  ;;  %1123 = vpow2.f32 %v908_v15 }
 0x143   : > { %v1104_v21 = vpop.eup %1103  ;;  %v911_v22 = vmul.f32 -1.442695, %v531_v20 }
 0x144   : > { %v1429_v23 = vpop.eup %1105  ;;  %v701_v24 = vadd.f32 1.0, %v1104_v21  ;;  %1125 = vpow2.f32 %v910_v19 }
 0x145   : > { %v1108_v25 = vpop.eup %1107  ;;  %1127 = vtanh.f32 %v999_v13 }
 0x146   : > { %v1431_v26 = vpop.eup %1109  ;;  %1129 = vrcp.f32 %v701_v24  ;;  %v695_v27 = vadd.f32 1.0, %v1108_v25  ;;  %v535_v29 = vpop.f32.mrb[12].mxu0 }
 0x147   : > { %v1112_v28 = vpop.eup %1111  ;;  %1131 = vpow2.f32 %v911_v22  ;;  %v913_v32 = vmul.f32 -1.442695, %v535_v29  ;;  %v537_v33 = vpop.f32.mrb[13].mxu0 }
 0x148   : > { %v1433_v30 = vpop.eup %1113  ;;  %1133 = vrcp.f32 %v695_v27  ;;  %v704_v31 = vadd.f32 1.0, %v1112_v28  ;;  %v914_v35 = vmul.f32 -1.442695, %v537_v33  ;;  %v539_v36 = vpop.f32.mrb[14].mxu0 }
 0x149   : > { %v1116_v34 = vpop.eup %1115  ;;  %1135 = vtanh.f32 %v633_v17  ;;  %v916_v39 = vmul.f32 -1.442695, %v539_v36  ;;  %v541_v40 = vpop.f32.mrb[15].mxu0 }
 0x14a   : > { %v1118_v37 = vpop.eup %1117  ;;  %1137 = vrcp.f32 %v704_v31  ;;  %v698_v38 = vadd.f32 1.0, %v1116_v34  ;;  %v917_v49 = vmul.f32 -1.442695, %v541_v40 }
 0x14b   : > { %v1120_v41 = vpop.eup %1119  ;;  %v749_v42 = vadd.f32 %v1118_v37, %v1088_v1  ;;  %1139 = vpow2.f32 %v913_v32 }
 0x14c   : > { %v1122_v43 = vpop.eup %1121  ;;  %1141 = vrcp.f32 %v698_v38  ;;  %v743_v44 = vadd.f32 %v1120_v41, %v1098_v10 }
 0x14d   : > { %v1124_v45 = vpop.eup %1123  ;;  %v693_v46 = vadd.f32 1.0, %v1122_v43  ;;  %1143 = vpow2.f32 %v914_v35 }
 0x14e   : > { %v1126_v47 = vpop.eup %1125  ;;  %v694_v48 = vadd.f32 1.0, %v1124_v45  ;;  %1145 = vpow2.f32 %v916_v39  ;;  %v545_v51 = vpop.f32.mrb[16].mxu0 }
 0x14f   : > { %v1128_v50 = vpop.eup %1127  ;;  %1147 = vtanh.f32 %v1417_v0  ;;  %v696_v53 = vadd.f32 1.0, %v1126_v47  ;;  %v547_v55 = vpop.f32.mrb[17].mxu0 }
 0x150   : > { %v1130_v52 = vpop.eup %1129  ;;  %1149 = vrcp.f32 %v693_v46  ;;  %v752_v54 = vadd.f32 %v1128_v50, %v1100_v14  ;;  %v549_v58 = vpop.f32.mrb[18].mxu0 }
 0x151   : > { %v1132_v56 = vpop.eup %1131  ;;  %v761_v57 = vmul.f32 %v1130_v52, %v749_v42  ;;  %1151 = vrcp.f32 %v694_v48  ;;  %v551_v60 = vpop.f32.mrb[19].mxu0 }
 0x152   : > { %v1134_v59 = vpop.eup %1133  ;;  %1153 = vpow2.f32 %v917_v49  ;;  %v697_v0 = vadd.f32 1.0, %v1132_v56 }
 0x153   : > { %v1136_v61 = vpop.eup %1135  ;;  %773 = vst [vmem:[%s1438_s21 + $0x40] sm:$0xff] %v761_v57  ;;  %v755_v62 = vmul.f32 %v1134_v59, %v743_v44  ;;  %1155 = vtanh.f32 %v545_v51 }
 0x154   : > { %v1138_v63 = vpop.eup %1137  ;;  %1157 = vrcp.f32 %v696_v53  ;;  %v746_v1 = vadd.f32 %v1136_v61, %v1427_v18 }
 0x155   : > { %v1140_v2 = vpop.eup %1139  ;;  %767 = vst [vmem:[%s1438_s21 + $0x10] sm:$0xff] %v755_v62  ;;  %v764_v6 = vmul.f32 %v1138_v63, %v752_v54  ;;  %1159 = vtanh.f32 %v547_v55 }
 0x156   : > { %v1142_v8 = vpop.eup %1141  ;;  %v699_v9 = vadd.f32 1.0, %v1140_v2  ;;  %1161 = vtanh.f32 %v549_v58  ;;  %v555_v12 = vpop.f32.mrb[20].mxu0 }
 0x157   : > { %v1144_v10 = vpop.eup %1143  ;;  %776 = vst [vmem:[%s1438_s21 + $0x58] sm:$0xff] %v764_v6  ;;  %v758_v11 = vmul.f32 %v1142_v8, %v746_v1  ;;  %1163 = vtanh.f32 %v551_v60  ;;  %v557_v15 = vpop.f32.mrb[21].mxu0 }
 0x158   : > { %v1146_v13 = vpop.eup %1145  ;;  %1165 = vrcp.f32 %v697_v0  ;;  %v700_v14 = vadd.f32 1.0, %v1144_v10  ;;  %v559_v17 = vpop.f32.mrb[22].mxu0 }
 0x159   : > { %v1148_v16 = vpop.eup %1147  ;;  %770 = vst [vmem:[%s1438_s21 + $0x28] sm:$0xff] %v758_v11  ;;  %1167 = vtanh.f32 %v555_v12  ;;  %v561_v19 = vpop.f32.mrb[23].mxu0  ;;  %v702_v21 = vadd.f32 1.0, %v1146_v13 }
 0x15a   : > { %v1150_v18 = vpop.eup %1149  ;;  %1169 = vrcp.f32 %v699_v9 }
 0x15b   : > { %v1152_v20 = vpop.eup %1151  ;;  %1171 = vrcp.f32 %v700_v14 }
 0x15c   : > { %v1154_v22 = vpop.eup %1153  ;;  %1173 = vtanh.f32 %v557_v15 }
 0x15d   : > { %v1156_v24 = vpop.eup %1155  ;;  %v703_v25 = vadd.f32 1.0, %v1154_v22  ;;  %1175 = vtanh.f32 %v559_v17 }
 0x15e   : > { %v1158_v27 = vpop.eup %1157  ;;  %v741_v28 = vadd.f32 %v1156_v24, %v1419_v3  ;;  %1177 = vtanh.f32 %v561_v19 }
 0x15f   : > { %v1160_v29 = vpop.eup %1159  ;;  %1179 = vrcp.f32 %v702_v21 }
 0x160   : > { %v1162_v31 = vpop.eup %1161  ;;  %1181 = vrcp.f32 %v703_v25  ;;  %v753_v32 = vmul.f32 %v1150_v18, %v741_v28  ;;  %v742_v33 = vadd.f32 %v1160_v29, %v1421_v4 }
 0x161   : > { %v1164_v34 = vpop.eup %1163  ;;  %v744_v35 = vadd.f32 %v1162_v31, %v1423_v5 }
 0x162   : > { %v1166_v36 = vpop.eup %1165  ;;  %765 = vst [vmem:[%s1438_s21] sm:$0xff] %v753_v32  ;;  %v754_v37 = vmul.f32 %v1152_v20, %v742_v33  ;;  %v745_v3 = vadd.f32 %v1164_v34, %v1425_v7 }
 0x163   : > { %v1168_v38 = vpop.eup %1167  ;;  %v756_v39 = vmul.f32 %v1158_v27, %v744_v35 }
 0x164   : > { %v1170_v40 = vpop.eup %1169  ;;  %766 = vst [vmem:[%s1438_s21 + $0x8] sm:$0xff] %v754_v37  ;;  %v757_v41 = vmul.f32 %v1166_v36, %v745_v3  ;;  %v747_v42 = vadd.f32 %v1168_v38, %v1429_v23 }
 0x165   : > { %v1172_v43 = vpop.eup %1171  ;;  %768 = vst [vmem:[%s1438_s21 + $0x18] sm:$0xff] %v756_v39 }
 0x166   : > { %v1174_v4 = vpop.eup %1173  ;;  %769 = vst [vmem:[%s1438_s21 + $0x20] sm:$0xff] %v757_v41  ;;  %v759_v5 = vmul.f32 %v1170_v40, %v747_v42 }
 0x167   : > { %v1176_v44 = vpop.eup %1175  ;;  %v748_v45 = vadd.f32 %v1174_v4, %v1431_v26  ;;  %784 = sbr.rel (!%p1303_p5) target bundleno = 395 (0x18b), region = 32 }
 0x168   : > { %v1178_v7 = vpop.eup %1177  ;;  %771 = vst [vmem:[%s1438_s21 + $0x30] sm:$0xff] %v759_v5  ;;  %v750_v46 = vadd.f32 %v1176_v44, %v1433_v30 }
 0x169   : > { %v1180_v47 = vpop.eup %1179  ;;  %v760_v48 = vmul.f32 %v1172_v43, %v748_v45  ;;  %v751_v49 = vadd.f32 %v1178_v7, %v1148_v16 }
 0x16a   : > { %v1182_v23 = vpop.eup %1181  ;;  %v762_v50 = vmul.f32 %v1180_v47, %v750_v46 }
 0x16b   : > { %772 = vst [vmem:[%s1438_s21 + $0x38] sm:$0xff] %v760_v48  ;;  %v763_v51 = vmul.f32 %v1182_v23, %v751_v49 }
 0x16c   : > { %774 = vst [vmem:[%s1438_s21 + $0x48] sm:$0xff] %v762_v50 }
 0x16d   : > { %775 = vst [vmem:[%s1438_s21 + $0x50] sm:$0xff] %v763_v51 }
 0x16e   : > { %s1541_s24 = smov (!%p787_p11, %s786_s24), 3 }
 0x16f   : > { %s1470_s25 = sshll.u32 %s1541_s24, 9 }
 0x170   : > { %s791_s26 = ssub.s32 1536, %s1470_s25 }
 0x171   : > { %792 = vsyncadd %s1462_s22, %s791_s26  ;;  %p920_p12 = scmp.ne.s32.totalorder %s1470_s25, 0  ;;  %s927_s19 = smul.u32 384, %s1286_s13 }
 0x172   : > { %s922_s27 = sshll.u32 %s1541_s24, 3  ;;  %s798_s28 = sshll.u32 %s1438_s21, 4  ;;  %s1483_s28 = int_to_ptr.vmem [resolvable:$true] %s798_s28 }
 0x173   : > { %s1481_s3 = scalar_lea.hbm %s1531_s2, %s927_s19  ;;  %s1183_s4 = scalar_lea.vmem %s1483_s28, %s1470_s25 }
 0x174   : > { %p1184_p13 = scmp.ne.s32.totalorder %s1483_s28, %s1183_s4  ;;  %s1247_s5 = smov [#allocation2]  }
 0x175   : > { %s1187_s6 = sshll.u32 %s1247_s5, 4  ;;  %s1188_s6 = int_to_ptr.vmem [resolvable:$false] %s1187_s6 }
 0x176   : > { %p1185_p0 = pnand %p1184_p13, %p920_p12  ;;  %s1189_s13 = scalar_lea.vmem %s1188_s6, 3072 }
 0x177   : > { %p1190_p2 = scmp.lt.s32.totalorder %s1483_s28, %s1188_s6  ;;  %p1191_p3 = scmp.lt.s32.totalorder %s1189_s13, %s1183_s4 }
 0x178   : > { %p1186_p1 = pneg %p1185_p0 }
 0x179   : > { %p1192_p4 = por %p1191_p3, %p1190_p2 }
 0x17b   : > { %p1193_p5 = pnand %p1192_p4, %p1186_p1 }
 0x17d   : > { %1196 = shalt.err (!%p1193_p5)
}
 0x17e   : > { %s1197_s7 = scalar_lea.hbm %s1481_s3, %s1470_s25  ;;  %s1201_s16 = scalar_lea.hbm %s1531_s2, 2560 }
 0x17f   : > { %p1198_p7 = scmp.ne.s32.totalorder %s1481_s3, %s1197_s7  ;;  %p1202_p10 = scmp.lt.u32.totalorder %s1481_s3, %s1531_s2 }
 0x180   : > { %p1203_p11 = scmp.lt.u32.totalorder %s1201_s16, %s1197_s7  ;;  %p1205_p0 = scmp.lt.u32.totalorder %s1197_s7, %s1481_s3 }
 0x181   : > { %p1199_p8 = pnand %p1198_p7, %p920_p12 }
 0x182   : > { %p1204_p13 = por %p1203_p11, %p1202_p10 }
 0x183   : > { %p1200_p9 = pneg %p1199_p8 }
 0x184   : > { %p1206_p1 = por %p1205_p0, %p1204_p13 }
 0x186   : > { %p1207_p2 = pnand %p1206_p1, %p1200_p9 }
 0x188   : > { %1210 = shalt.err (!%p1207_p2)
}
 0x189   : > { %s1248_s23 = smov 384   ;;  %s1249_s26 = smov 640  }
 0x18a   : > { %804 = dma.vmem_to_hbm [thread:$0]  (%p920_p12), %s1483_s28, %s1470_s25, %s1481_s3, %s1462_s22, %s1248_s23, %s1249_s26, %s922_s27  }
 0x18b PF: > { %p1022_p3 = scmp.ge.s32.totalorder %s1245_s12, 2  ;;  %s813_s19 = sand.u32 1, %s1233_s9  }
 0x18c   : > { %s814_s29 = scalar_lea.sflag [#allocation3], %s813_s19 }
 0x18d   : > { %p1019_p4 = pnand %p1022_p3, %p1307_p6 }
 0x18f   : > { %1228 = dma.done.wait (!%p1019_p4), %s814_s29, 1536  }
 0x190   : > { %1230 = vsyncadd (!%p1019_p4), %s814_s29, 4294965760  ;;  %p12_p5 = scmp.ge.s32.totalorder %s1290_s15, 4   ;;  %s1534_s9 = smov %s1237_s10 }
 0x191   : > { %s1535_s10 = smov %s1241_s11  ;;  %s1536_s11 = smov %s1301_s18 }
 0x192   : > { %s1537_s12 = smov %s1290_s15  ;;  %14 = sbr.rel (!%p12_p5) target bundleno = 3 (0x3), region = 63 }
 0x199   :  { %819 = vsyncpa [#allocation3], 1 }
 0x19a   :  { %821 = vsyncpa [#allocation3 + $0x1], 1 }

</bundles_post_ra>
